<compile_context>
chip_gen: v7x
topology: tpu7x:2x2x1
jax: 0.10.0
libtpu: 0.0.40
codegen_flags: <defaults>
</compile_context>

<pallas_src>
import math

import jax
import jax.numpy as jnp
from jax.experimental import pallas as pl
from jax.experimental.pallas import tpu as pltpu


# ----------------------------------------------------------------------------
# Fused kernel: all attention layers in one body, activation resident in VMEM.
# ----------------------------------------------------------------------------
def _make_fused_kernel(layer_dims):
    """layer_dims: tuple of (E, Dv) per layer. Kernel refs are
    (x_ref, w0, b0, w1, b1, ..., o_ref)."""
    def kernel(x_ref, *refs):
        o_ref = refs[-1]
        h = x_ref[...]                              # (NB, L, Din0)
        if h.dtype != jnp.float32:                  # no-op copy avoided for f32 inputs
            h = h.astype(jnp.float32)
        NB, L = h.shape[0], h.shape[1]

        for i, (E, Dv) in enumerate(layer_dims):
            w = refs[2 * i][...]                    # (Din_i, 2E+Dv); Q-part pre-scaled
            b = refs[2 * i + 1][...]                # (1, 2E+Dv);     Q-part pre-scaled

            # Single fused QKV projection for the whole batch block (one MXU push).
            hf = h.reshape(NB * L, h.shape[-1])
            qkv = jnp.dot(hf, w, preferred_element_type=jnp.float32) + b
            qkv = qkv.reshape(NB, L, 2 * E + Dv)
            q = qkv[:, :, :E]                       # scale already folded into w/b
            k = qkv[:, :, E:2 * E]
            v = qkv[:, :, 2 * E:]

            # scaled_dot_product_attention (3-D): softmax over the key axis.
            # Contraction on last dims of both operands -> no explicit k.T.
            s = jnp.einsum("bld,bmd->blm", q, k,
                           preferred_element_type=jnp.float32)      # (NB, L, L)
            m = jnp.max(s, axis=-1, keepdims=True)
            p = jnp.exp(s - m)
            denom = jnp.sum(p, axis=-1, keepdims=True)
            p = p * pl.reciprocal(denom, approx=True)                # EUP slot
            out = jnp.einsum("blm,bmd->bld", p, v,
                             preferred_element_type=jnp.float32)     # (NB, L, Dv)

            # only_attn path: activation ('relu') applied after every layer.
            h = jnp.maximum(out, 0.0)

        o_ref[...] = h.astype(o_ref.dtype)

    return kernel


def _tensorcores_per_device():
    """Best-effort detection of chips exposing >1 TensorCore per JAX device
    (v7x, and megacore v4/v5p). Falls back to 1 (v5e/v6e behaviour)."""
    try:
        kind = jax.devices()[0].device_kind.lower()
    except Exception:
        return 1
    return 2 if any(t in kind for t in ("v7", "7x", "v4", "v5p")) else 1


def multi_self_attention(x, params, batch_block=None):
    """only_attn (attnffn_num_layers == 0) forward: relu(SDPA layer) stacked.

    x: (N, L, Din). params: list of dicts from init_params (fused weights)."""
    N, L, Din = x.shape
    if batch_block is None:
        tc = _tensorcores_per_device()
        # v5e/v6e: 1 TC -> collapse batch into one grid step (grid is just a
        # serial loop there).  v7x/v4/v5p: one batch chunk per TensorCore.
        batch_block = (N // tc) if (tc > 1 and N % tc == 0) else N
    assert N % batch_block == 0
    NB = batch_block
    grid = (N // NB,)

    layer_dims = tuple(p["dims"] for p in params)
    Dv_last = layer_dims[-1][1]
    kernel = _make_fused_kernel(layer_dims)

    in_specs = [pl.BlockSpec((NB, L, Din), lambda b: (b, 0, 0))]
    args = [x]
    for p in params:
        w, b = p["w"], p["b"]
        in_specs.append(pl.BlockSpec(w.shape, lambda b: (0, 0)))
        in_specs.append(pl.BlockSpec(b.shape, lambda b: (0, 0)))
        args.extend([w, b])

    return pl.pallas_call(
        kernel,
        out_shape=jax.ShapeDtypeStruct((N, L, Dv_last), x.dtype),
        grid=grid,
        in_specs=in_specs,
        out_specs=pl.BlockSpec((NB, L, Dv_last), lambda b: (b, 0, 0)),
        compiler_params=pltpu.CompilerParams(
            dimension_semantics=("parallel",)),
    )(*args)


# ----------------------------------------------------------------------------
# Parameter construction mirroring MultiSelfAttention.__init__/init().
# ----------------------------------------------------------------------------
def init_params(key, in_dim, key_dim, out_dim, num_heads, num_layers):
    """Returns per-layer dicts with:
         w, b     : fused (Din, 2E+Dv) / (1, 2E+Dv); Q block pre-scaled by 1/sqrt(E)
         dims     : (E, Dv)
         wq,bq,wk,bk,wv,bv : raw (Din,*) projections for the plain-JAX reference."""
    params = []
    for i in range(num_layers):
        lin = in_dim if i == 0 else key_dim
        lout_qk = key_dim * num_heads
        lout_v = (out_dim if i == num_layers - 1 else key_dim) * num_heads
        key, k1, k2, k3 = jax.random.split(key, 4)

        def conv_w(k, cout, cin):
            # MultiSelfAttention.init(): identity when conv weight is square,
            # otherwise Conv1d-style (deterministic) uniform init.
            if cout == cin:
                return jnp.eye(cout, dtype=jnp.float32)
            bound = 1.0 / math.sqrt(cin)
            return jax.random.uniform(k, (cout, cin), jnp.float32, -bound, bound)

        wq = conv_w(k1, lout_qk, lin).T          # (Din, E)
        wk = conv_w(k2, lout_qk, lin).T
        wv = conv_w(k3, lout_v, lin).T           # (Din, Dv)
        bq = jnp.zeros((1, lout_qk), jnp.float32)   # init(): bias = 0
        bk = jnp.zeros((1, lout_qk), jnp.float32)
        bv = jnp.zeros((1, lout_v), jnp.float32)

        # Fold SDPA scale 1/sqrt(E) into the Q projection; fuse Q|K|V.
        scale = 1.0 / math.sqrt(lout_qk)
        w_fused = jnp.concatenate([wq * scale, wk, wv], axis=1)   # (Din, 2E+Dv)
        b_fused = jnp.concatenate([bq * scale, bk, bv], axis=1)   # (1, 2E+Dv)

        params.append(dict(
            w=w_fused, b=b_fused, dims=(lout_qk, lout_v),
            wq=wq, bq=bq, wk=wk, bk=bk, wv=wv, bv=bv,
        ))
    return params


def reference(x, params):
    """Plain-JAX reference matching the PyTorch forward (for validation)."""
    for p in params:
        q = x @ p["wq"] + p["bq"]
        k = x @ p["wk"] + p["bk"]
        v = x @ p["wv"] + p["bv"]
        scale = 1.0 / math.sqrt(q.shape[-1])
        s = jnp.einsum("nld,nmd->nlm", q, k) * scale
        a = jax.nn.softmax(s, axis=-1)
        x = jnp.maximum(jnp.einsum("nlm,nmd->nld", a, v), 0.0)
    return x


if __name__ == "__main__":
    # Module config: in_dim=8, key_dim=16, out_dim=8, num_heads=1, num_layers=2,
    # attnffn_num_layers=0, kernel_size=1.  Input x: (N=2, L=16, D=8).
    in_dim, key_dim, out_dim, num_heads, num_layers = 8, 16, 8, 1, 2
    N, L = 2, 16

    root = jax.random.PRNGKey(0)
    kx, kp = jax.random.split(root)
    x = jax.random.normal(kx, (N, L, in_dim), dtype=jnp.float32)
    params = init_params(kp, in_dim, key_dim, out_dim, num_heads, num_layers)

    out = jax.block_until_ready(multi_self_attention(x, params))
    ref = jax.block_until_ready(reference(x, params))

    assert out.shape == (N, L, out_dim * num_heads), out.shape
    # Tolerance relaxed slightly vs 1e-4 because the softmax denominator uses
    # the EUP approximate reciprocal (pl.reciprocal(approx=True)).
    err = float(jnp.max(jnp.abs(out - ref)))
    assert err < 2e-3, err

    print("KERNEL_OK")
</pallas_src>

<mosaic_0001>
module attributes {stable_mosaic.version = 11 : i64} {
  func.func @kernel(%arg0: i32, %arg1: memref<2x16x8xf32, #tpu.memory_space<vmem>>, %arg2: memref<8x48xf32, #tpu.memory_space<vmem>>, %arg3: memref<1x48xf32, #tpu.memory_space<vmem>>, %arg4: memref<16x40xf32, #tpu.memory_space<vmem>>, %arg5: memref<1x40xf32, #tpu.memory_space<vmem>>, %arg6: memref<2x16x8xf32, #tpu.memory_space<vmem>>) attributes {dimension_semantics = [#tpu.dimension_semantics<parallel>], iteration_bounds = array<i64: 1>, scalar_prefetch = 0 : i64, scratch_operands = 0 : i64, tpu.core_type = #tpu.core_type<tc>, window_params = [{transform_indices = @transform_0, window_bounds = array<i64: 2, 16, 8>}, {pipeline_mode = #tpu.pipeline_mode<synchronous>, transform_indices = @transform_1, window_bounds = array<i64: 8, 48>}, {pipeline_mode = #tpu.pipeline_mode<synchronous>, transform_indices = @transform_2, window_bounds = array<i64: 1, 48>}, {pipeline_mode = #tpu.pipeline_mode<synchronous>, transform_indices = @transform_3, window_bounds = array<i64: 16, 40>}, {pipeline_mode = #tpu.pipeline_mode<synchronous>, transform_indices = @transform_4, window_bounds = array<i64: 1, 40>}, {transform_indices = @transform_5, window_bounds = array<i64: 2, 16, 8>}]} {
    %c0 = arith.constant 0 : index
    %c0_0 = arith.constant 0 : index
    %c0_1 = arith.constant 0 : index
    %0 = vector.load %arg1[%c0, %c0_0, %c0_1] : memref<2x16x8xf32, #tpu.memory_space<vmem>>, vector<2x16x8xf32>
    %c0_2 = arith.constant 0 : index
    %c0_3 = arith.constant 0 : index
    %1 = vector.load %arg2[%c0_2, %c0_3] : memref<8x48xf32, #tpu.memory_space<vmem>>, vector<8x48xf32>
    %c0_4 = arith.constant 0 : index
    %c0_5 = arith.constant 0 : index
    %2 = vector.load %arg3[%c0_4, %c0_5] : memref<1x48xf32, #tpu.memory_space<vmem>>, vector<1x48xf32>
    %3 = vector.shape_cast %0 : vector<2x16x8xf32> to vector<32x8xf32>
    %cst = arith.constant dense<0.000000e+00> : vector<32x48xf32>
    %4 = tpu.matmul %3, %1, %cst {dimension_numbers = #tpu.dot_dimension_numbers<[1], [0], [0], [1], [0, 0, 1, 1], [], []>} : vector<32x8xf32>, vector<8x48xf32>, vector<32x48xf32> -> vector<32x48xf32>
    %5 = vector.broadcast %2 : vector<1x48xf32> to vector<32x48xf32>
    %6 = arith.addf %4, %5 : vector<32x48xf32>
    %7 = vector.shape_cast %6 : vector<32x48xf32> to vector<2x16x48xf32>
    %8 = vector.extract_strided_slice %7 {offsets = [0, 0, 0], sizes = [2, 16, 16], strides = [1, 1, 1]} : vector<2x16x48xf32> to vector<2x16x16xf32>
    %9 = vector.extract_strided_slice %7 {offsets = [0, 0, 16], sizes = [2, 16, 16], strides = [1, 1, 1]} : vector<2x16x48xf32> to vector<2x16x16xf32>
    %10 = vector.extract_strided_slice %7 {offsets = [0, 0, 32], sizes = [2, 16, 16], strides = [1, 1, 1]} : vector<2x16x48xf32> to vector<2x16x16xf32>
    "tpu.trace_start"() <{level = 10 : i32, message = "bld,bmd->blm"}> : () -> ()
    %cst_6 = arith.constant dense<0.000000e+00> : vector<2x16x16xf32>
    %11 = tpu.matmul %8, %9, %cst_6 {dimension_numbers = #tpu.dot_dimension_numbers<[2], [2], [1], [1], [0, 0, 0, 1, 1, 1], [0], [0]>} : vector<2x16x16xf32>, vector<2x16x16xf32>, vector<2x16x16xf32> -> vector<2x16x16xf32>
    "tpu.trace_stop"() : () -> ()
    %cst_7 = arith.constant dense<0xFF800000> : vector<2x16xf32>
    %12 = vector.multi_reduction <maximumf>, %11, %cst_7 [2] : vector<2x16x16xf32> to vector<2x16xf32>
    %13 = vector.shape_cast %12 : vector<2x16xf32> to vector<2x16x1xf32>
    %14 = vector.broadcast %13 : vector<2x16x1xf32> to vector<2x16x16xf32>
    %15 = arith.subf %11, %14 : vector<2x16x16xf32>
    %16 = math.exp %15 : vector<2x16x16xf32>
    %cst_8 = arith.constant dense<0.000000e+00> : vector<2x16xf32>
    %17 = vector.multi_reduction <add>, %16, %cst_8 [2] : vector<2x16x16xf32> to vector<2x16xf32>
    %18 = vector.shape_cast %17 : vector<2x16xf32> to vector<2x16x1xf32>
    %19 = tpu.reciprocal %18 {approx = true} : vector<2x16x1xf32> -> vector<2x16x1xf32>
    %20 = vector.broadcast %19 : vector<2x16x1xf32> to vector<2x16x16xf32>
    %21 = arith.mulf %16, %20 : vector<2x16x16xf32>
    "tpu.trace_start"() <{level = 10 : i32, message = "blm,bmd->bld"}> : () -> ()
    %cst_9 = arith.constant dense<0.000000e+00> : vector<2x16x16xf32>
    %22 = tpu.matmul %21, %10, %cst_9 {dimension_numbers = #tpu.dot_dimension_numbers<[2], [1], [1], [2], [0, 0, 0, 1, 1, 2], [0], [0]>} : vector<2x16x16xf32>, vector<2x16x16xf32>, vector<2x16x16xf32> -> vector<2x16x16xf32>
    "tpu.trace_stop"() : () -> ()
    %cst_10 = arith.constant 0.000000e+00 : f32
    %23 = vector.broadcast %cst_10 : f32 to vector<2x16x16xf32>
    %24 = arith.maximumf %22, %23 : vector<2x16x16xf32>
    %c0_11 = arith.constant 0 : index
    %c0_12 = arith.constant 0 : index
    %25 = vector.load %arg4[%c0_11, %c0_12] : memref<16x40xf32, #tpu.memory_space<vmem>>, vector<16x40xf32>
    %c0_13 = arith.constant 0 : index
    %c0_14 = arith.constant 0 : index
    %26 = vector.load %arg5[%c0_13, %c0_14] : memref<1x40xf32, #tpu.memory_space<vmem>>, vector<1x40xf32>
    %27 = vector.shape_cast %24 : vector<2x16x16xf32> to vector<32x16xf32>
    %cst_15 = arith.constant dense<0.000000e+00> : vector<32x40xf32>
    %28 = tpu.matmul %27, %25, %cst_15 {dimension_numbers = #tpu.dot_dimension_numbers<[1], [0], [0], [1], [0, 0, 1, 1], [], []>} : vector<32x16xf32>, vector<16x40xf32>, vector<32x40xf32> -> vector<32x40xf32>
    %29 = vector.broadcast %26 : vector<1x40xf32> to vector<32x40xf32>
    %30 = arith.addf %28, %29 : vector<32x40xf32>
    %31 = vector.shape_cast %30 : vector<32x40xf32> to vector<2x16x40xf32>
    %32 = vector.extract_strided_slice %31 {offsets = [0, 0, 0], sizes = [2, 16, 16], strides = [1, 1, 1]} : vector<2x16x40xf32> to vector<2x16x16xf32>
    %33 = vector.extract_strided_slice %31 {offsets = [0, 0, 16], sizes = [2, 16, 16], strides = [1, 1, 1]} : vector<2x16x40xf32> to vector<2x16x16xf32>
    %34 = vector.extract_strided_slice %31 {offsets = [0, 0, 32], sizes = [2, 16, 8], strides = [1, 1, 1]} : vector<2x16x40xf32> to vector<2x16x8xf32>
    "tpu.trace_start"() <{level = 10 : i32, message = "bld,bmd->blm"}> : () -> ()
    %cst_16 = arith.constant dense<0.000000e+00> : vector<2x16x16xf32>
    %35 = tpu.matmul %32, %33, %cst_16 {dimension_numbers = #tpu.dot_dimension_numbers<[2], [2], [1], [1], [0, 0, 0, 1, 1, 1], [0], [0]>} : vector<2x16x16xf32>, vector<2x16x16xf32>, vector<2x16x16xf32> -> vector<2x16x16xf32>
    "tpu.trace_stop"() : () -> ()
    %cst_17 = arith.constant dense<0xFF800000> : vector<2x16xf32>
    %36 = vector.multi_reduction <maximumf>, %35, %cst_17 [2] : vector<2x16x16xf32> to vector<2x16xf32>
    %37 = vector.shape_cast %36 : vector<2x16xf32> to vector<2x16x1xf32>
    %38 = vector.broadcast %37 : vector<2x16x1xf32> to vector<2x16x16xf32>
    %39 = arith.subf %35, %38 : vector<2x16x16xf32>
    %40 = math.exp %39 : vector<2x16x16xf32>
    %cst_18 = arith.constant dense<0.000000e+00> : vector<2x16xf32>
    %41 = vector.multi_reduction <add>, %40, %cst_18 [2] : vector<2x16x16xf32> to vector<2x16xf32>
    %42 = vector.shape_cast %41 : vector<2x16xf32> to vector<2x16x1xf32>
    %43 = tpu.reciprocal %42 {approx = true} : vector<2x16x1xf32> -> vector<2x16x1xf32>
    %44 = vector.broadcast %43 : vector<2x16x1xf32> to vector<2x16x16xf32>
    %45 = arith.mulf %40, %44 : vector<2x16x16xf32>
    "tpu.trace_start"() <{level = 10 : i32, message = "blm,bmd->bld"}> : () -> ()
    %cst_19 = arith.constant dense<0.000000e+00> : vector<2x16x8xf32>
    %46 = tpu.matmul %45, %34, %cst_19 {dimension_numbers = #tpu.dot_dimension_numbers<[2], [1], [1], [2], [0, 0, 0, 1, 1, 2], [0], [0]>} : vector<2x16x16xf32>, vector<2x16x8xf32>, vector<2x16x8xf32> -> vector<2x16x8xf32>
    "tpu.trace_stop"() : () -> ()
    %cst_20 = arith.constant 0.000000e+00 : f32
    %47 = vector.broadcast %cst_20 : f32 to vector<2x16x8xf32>
    %48 = arith.maximumf %46, %47 : vector<2x16x8xf32>
    %c0_21 = arith.constant 0 : index
    %c0_22 = arith.constant 0 : index
    %c0_23 = arith.constant 0 : index
    %49 = vector.load %arg6[%c0_21, %c0_22, %c0_23] : memref<2x16x8xf32, #tpu.memory_space<vmem>>, vector<2x16x8xf32>
    tpu.vector_store %arg6[%c0_21, %c0_22, %c0_23], %48 {strides = array<i32>} : memref<2x16x8xf32, #tpu.memory_space<vmem>>, vector<2x16x8xf32>,
    return
  }
  func.func @transform_0(%arg0: i32) -> (i32, i32, i32) {
    %c0_i32 = arith.constant 0 : i32
    %c0_i32_0 = arith.constant 0 : i32
    %c0_i32_1 = arith.constant 0 : i32
    return %arg0, %c0_i32, %c0_i32_0 : i32, i32, i32
  }
  func.func @transform_1(%arg0: i32) -> (i32, i32) {
    %c0_i32 = arith.constant 0 : i32
    %c0_i32_0 = arith.constant 0 : i32
    %c0_i32_1 = arith.constant 0 : i32
    return %c0_i32, %c0_i32_0 : i32, i32
  }
  func.func @transform_2(%arg0: i32) -> (i32, i32) {
    %c0_i32 = arith.constant 0 : i32
    %c0_i32_0 = arith.constant 0 : i32
    %c0_i32_1 = arith.constant 0 : i32
    return %c0_i32, %c0_i32_0 : i32, i32
  }
  func.func @transform_3(%arg0: i32) -> (i32, i32) {
    %c0_i32 = arith.constant 0 : i32
    %c0_i32_0 = arith.constant 0 : i32
    %c0_i32_1 = arith.constant 0 : i32
    return %c0_i32, %c0_i32_0 : i32, i32
  }
  func.func @transform_4(%arg0: i32) -> (i32, i32) {
    %c0_i32 = arith.constant 0 : i32
    %c0_i32_0 = arith.constant 0 : i32
    %c0_i32_1 = arith.constant 0 : i32
    return %c0_i32, %c0_i32_0 : i32, i32
  }
  func.func @transform_5(%arg0: i32) -> (i32, i32, i32) {
    %c0_i32 = arith.constant 0 : i32
    %c0_i32_0 = arith.constant 0 : i32
    %c0_i32_1 = arith.constant 0 : i32
    return %arg0, %c0_i32, %c0_i32_0 : i32, i32, i32
  }
}

</mosaic_0001>

<bundles_post_ra>
// kernel: tpu_custom_call.1
= control target key start
LH: loop header
LB: loop body
LE: loop exit
PB: predicated region body
PF: predicated region fallthrough
CT: control target
= control target key end

     0   :  { %vm32_vm0 = vcmask 64512   ;;  %vm136_vm1 = vcmask 130048   ;;  %s1463_s1 = inlined_call_operand.vmem [shape: f32[8,48], index: 1, kind: input, shape index: {}]   ;;  %s1464_s0 = inlined_call_operand.vmem [shape: f32[2,16,8], index: 0, kind: input, shape index: {}]   ;;  %s1465_s2 = inlined_call_operand.vmem [shape: f32[1,48], index: 2, kind: input, shape index: {}]   ;;  %s1466_s3 = inlined_call_operand.vmem [shape: f32[16,40], index: 3, kind: input, shape index: {}]   ;;  %s1467_s4 = inlined_call_operand.vmem [shape: f32[1,40], index: 4, kind: input, shape index: {}]   ;;  %s1468_s5 = inlined_call_operand.vmem [shape: f32[2,16,8], index: 5, kind: output, shape index: {}]  }
   0x1   :  { %v24_v0 = vld [vmem:[%s1463_s1] sm:$0xff]  ;;  %v21_v2 = vld [vmem:[%s1464_s0 + $0x8] sm:$0xff]  ;;  %v22_v3 = vld [vmem:[%s1464_s0 + $0x10] sm:$0xff] }
   0x2   :  { %v20_v1 = vld [vmem:[%s1464_s0] sm:$0xff]  ;;  %1122 = vmatprep.subr.mxu0 %v24_v0  ;;  %v23_v4 = vld [vmem:[%s1464_s0 + $0x18] sm:$0xff]  ;;  %s1314_s0 = smov 112   ;;  %vm1377_vm2 = vmpackc.low %vm136_vm1, %vm136_vm1 }
   0x3   :  { %1124 = vmatprep.mubr.msk.f32.mxu0 %vm32_vm0, %v20_v1  ;;  %1123 = vmatpush3.msra.mxu0 %v24_v0  ;;  %v1045_v5 = vld [vmem:[%s1465_s2] ss:$0 sm:$0xff]  ;;  %s1315_s2 = smov 96  }
   0x4   :  { %1125 = vmatmul.mubr.msk.f32.vlgmr.msra.gmra.mrb[0].mxu0 %vm32_vm0, %v21_v2 }
   0x5   :  { %1127 = vmatprep.mubr.msk.f32.mxu0 %vm32_vm0, %v22_v3 }
   0x8   :  { %1128 = vmatmul.mubr.msk.f32.gmra.mrb[2].mxu0 %vm32_vm0, %v23_v4 }
  0xd7   :  { %v1126_v6 = vpop.f32.mrb[0].mxu0 }
  0xd8   :  { %v117_v7 = vadd.f32 %v1126_v6, %v1045_v5  ;;  %v111_v8 = vpop.f32.mrb[1].mxu0 }
  0xd9   :  { %v112_v9 = vadd.f32 %v1045_v5, %v111_v8 }
  0xdb   :  { %v1129_v10 = vpop.f32.mrb[2].mxu0  ;;  %1134 = vmatprep.mubr.msk.f32.mxu1 %vm136_vm1, %v112_v9  ;;  %v1369_v11 = vpack.i.bf16 %v117_v7, %v112_v9  ;;  %v531_v9 = vld [vmem:[%s1466_s3] sm:$0xff] }
  0xdc   :  { %v127_v12 = vadd.f32 %v1129_v10, %v1045_v5  ;;  %v121_v13 = vpop.f32.mrb[3].mxu0  ;;  %v532_v10 = vld [vmem:[%s1466_s3 + $0x8] sm:$0xff] }
  0xdd   :  { %v122_v14 = vadd.f32 %v1045_v5, %v121_v13  ;;  %1243 = vrot.lane.b32.xlu0 %v1369_v11, %s1314_s0 }
  0xdf   :  { %v1247_v15 = vpack.i.bf16 %v127_v12, %v122_v14  ;;  %1141 = vmatprep.mubr.msk.f32.mxu0 %vm136_vm1, %v122_v14 }
  0xe1   :  { %1248 = vrot.lane.b32.xlu0 %v1247_v15, %s1314_s0 }
 0x14f   :  { %v1244_v16 = vpop.permute.xlu0 %1243 }
 0x150   :  { %v1246_v17 = vunpack.i.h.bf16 %v1244_v16  ;;  %v1245_v18 = vunpack.i.l.bf16 %v1244_v16 }
 0x152   :  { %v1196_v20 = vpack.c.bf16 %v1246_v17, %v1245_v18 }
 0x153   :  { %v1249_v21 = vpop.permute.xlu0 %1248 }
 0x154   :  { %v1251_v22 = vunpack.i.h.bf16 %v1249_v21  ;;  %v1250_v23 = vunpack.i.l.bf16 %v1249_v21  ;;  %1198 = vmatprep.subr.msk.bf16.mxu1 %vm1377_vm2, %v1196_v20  ;;  %v1062_v21 = vld [vmem:[%s1467_s4] ss:$0 sm:$0xff] }
 0x155   :  { %1201 = vmatpush3.bf16.xpose.msk.msra.mxu1 %vm1377_vm2, %v1196_v20 }
 0x156   :  { %v1202_v24 = vpack.c.bf16 %v1251_v22, %v1250_v23 }
 0x158   :  { %1204 = vmatprep.subr.msk.bf16.mxu0 %vm1377_vm2, %v1202_v24 }
 0x159   :  { %1207 = vmatpush3.bf16.xpose.msk.msra.mxu0 %vm1377_vm2, %v1202_v24 }
 0x15c   :  { %1135 = vmatmul.mubr.msk.f32.vlgmr.msra.gmra.mrb[0].mxu1 %vm136_vm1, %v117_v7 }
 0x160   :  { %1142 = vmatmul.mubr.msk.f32.vlgmr.msra.gmra.mrb[4].mxu0 %vm136_vm1, %v127_v12 }
 0x22f   :  { %v1136_v25 = vpop.f32.mrb[0].mxu1 }
 0x230   :  { %v211_v26 = vpop.f32.mrb[1].mxu1  ;;  %v312_v31 = vsel %vm136_vm1, %v1136_v25, -inf }
 0x231   :  { %v309_v27 = vsel %vm136_vm1, %v211_v26, -inf }
 0x232   :  { %310 = vmax.xlane.f32.xlu1 %v309_v27 }
 0x233   :  { %v1143_v28 = vpop.f32.mrb[4].mxu0 }
 0x234   :  { %v300_v29 = vpop.f32.mrb[5].mxu0  ;;  %v318_v32 = vsel %vm136_vm1, %v1143_v28, -inf }
 0x235   :  { %v315_v30 = vsel %vm136_vm1, %v300_v29, -inf }
 0x236   :  { %316 = vmax.xlane.f32.xlu0 %v315_v30  ;;  %313 = vmax.xlane.f32.xlu1 %v312_v31 }
 0x23a   :  { %319 = vmax.xlane.f32.xlu1 %v318_v32 }
 0x24c   :  { %1258 = vrot.lane.b32.xlu0 %v1247_v15, %s1315_s2 }
 0x2bf   :  { %v311_v33 = vpop.xlane.xlu1 %310 }
 0x2c0   :  { %v321_v34 = vsub.f32 %v211_v26, %v311_v33 }
 0x2c2   :  { %v325_v39 = vmul.f32 1.442695, %v321_v34 }
 0x2c3   :  { %v317_v35 = vpop.xlane.xlu0 %316  ;;  %v314_v36 = vpop.xlane.xlu1 %313 }
 0x2c4   :  { %v322_v37 = vsub.f32 %v1136_v25, %v314_v36  ;;  %v323_v46 = vsub.f32 %v300_v29, %v317_v35 }
 0x2c6   :  { %v327_v38 = vmul.f32 1.442695, %v322_v37  ;;  %v329_v48 = vmul.f32 1.442695, %v323_v46 }
 0x2c7   :  { %v1259_v40 = vpop.permute.xlu0 %1258  ;;  %v320_v41 = vpop.xlane.xlu1 %319 }
 0x2c8   :  { %v1261_v42 = vunpack.i.h.bf16 %v1259_v40  ;;  %v1260_v43 = vunpack.i.l.bf16 %v1259_v40  ;;  %v324_v44 = vsub.f32 %v1143_v28, %v320_v41  ;;  %1282 = vpow2.f32 %v327_v38 }
 0x2c9   :  { %1284 = vpow2.f32 %v325_v39 }
 0x2ca   :  { %v1212_v45 = vpack.c.bf16 %v1261_v42, %v1260_v43  ;;  %v331_v47 = vmul.f32 1.442695, %v324_v44 }
 0x2cc   :  { %1213 = vmatprep.subr.bf16.mxu0 %v1212_v45  ;;  %1286 = vpow2.f32 %v331_v47 }
 0x2cd   :  { %1215 = vmatpush3.bf16.msra.mxu0 %v1212_v45  ;;  %1288 = vpow2.f32 %v329_v48 }
 0x2d2   :  { %v1283_v49 = vpop.eup %1282 }
 0x2d3   :  { %v336_v50 = vsel %vm136_vm1, %v1283_v49, 0.0  ;;  %v1285_v51 = vpop.eup %1284 }
 0x2d4   :  { %337 = vadd.xlane.f32.xlu1 %v336_v50  ;;  %v333_v52 = vsel %vm136_vm1, %v1285_v51, 0.0 }
 0x2d6   :  { %v1287_v53 = vpop.eup %1286 }
 0x2d7   :  { %v342_v54 = vsel %vm136_vm1, %v1287_v53, 0.0  ;;  %v1289_v55 = vpop.eup %1288 }
 0x2d8   :  { %334 = vadd.xlane.f32.xlu1 %v333_v52  ;;  %v339_v56 = vsel %vm136_vm1, %v1289_v55, 0.0 }
 0x2dc   :  { %343 = vadd.xlane.f32.xlu1 %v342_v54 }
 0x2e0   :  { %340 = vadd.xlane.f32.xlu1 %v339_v56 }
 0x2f1   :  { %1253 = vrot.lane.b32.xlu1 %v1369_v11, %s1315_s2  ;;  %v1216_v11 = vpack.c.bf16 %v532_v10, %v531_v9 }
 0x361   :  { %v338_v57 = vpop.xlane.xlu1 %337 }
 0x365   :  { %v335_v58 = vpop.xlane.xlu1 %334 }
 0x366   :  { %1290 = vrcp.f32 %v335_v58 }
 0x367   :  { %1292 = vrcp.f32 %v338_v57 }
 0x369   :  { %v344_v59 = vpop.xlane.xlu1 %343 }
 0x36a   :  { %1294 = vrcp.f32 %v344_v59 }
 0x36d   :  { %v341_v60 = vpop.xlane.xlu1 %340 }
 0x36e   :  { %1296 = vrcp.f32 %v341_v60 }
 0x370   :  { %v1291_v61 = vpop.eup %1290 }
 0x371   :  { %v1254_v62 = vpop.permute.xlu1 %1253  ;;  %v349_v63 = vmul.f32 %v1291_v61, %v1285_v51  ;;  %v1293_v3 = vpop.eup %1292 }
 0x372   :  { %v1256_v0 = vunpack.i.h.bf16 %v1254_v62  ;;  %v1255_v1 = vunpack.i.l.bf16 %v1254_v62  ;;  %v350_v6 = vmul.f32 %v1293_v3, %v1283_v49 }
 0x373   :  { %1148 = vmatprep.mubr.msk.f32.mxu1 %vm136_vm1, %v349_v63 }
 0x374   :  { %v1208_v2 = vpack.c.bf16 %v1256_v0, %v1255_v1  ;;  %v1295_v4 = vpop.eup %1294 }
 0x375   :  { %v352_v8 = vmul.f32 %v1295_v4, %v1287_v53 }
 0x376   :  { %1209 = vmatprep.subr.bf16.mxu1 %v1208_v2 }
 0x377   :  { %1211 = vmatpush3.bf16.msra.mxu1 %v1208_v2 }
 0x378   :  { %v1297_v5 = vpop.eup %1296  ;;  %1217 = vmatprep.subr.bf16.mxu1 %v1216_v11 }
 0x379   :  { %v351_v7 = vmul.f32 %v1297_v5, %v1289_v55 }
 0x37a   :  { %1149 = vmatmul.mubr.msk.f32.vlgmr.msra.gmra.mrb[2].mxu1 %vm136_vm1, %v350_v6 }
 0x37b   :  { %1155 = vmatprep.mubr.msk.f32.mxu0 %vm136_vm1, %v351_v7  ;;  %1219 = vmatpush3.bf16.msra.mxu1 %v1216_v11 }
 0x37c   :  { %1156 = vmatmul.mubr.msk.f32.vlgmr.msra.gmra.mrb[6].mxu0 %vm136_vm1, %v352_v8 }
 0x44d   :  { %v1150_v12 = vpop.f32.mrb[2].mxu1 }
 0x44e   :  { %v431_v13 = vpop.f32.mrb[3].mxu1  ;;  %v528_v16 = vmax.f32 %v1150_v12, 0.0 }
 0x44f   :  { %v527_v14 = vmax.f32 %v431_v13, 0.0  ;;  %v1157_v15 = vpop.f32.mrb[6].mxu0 }
 0x450   :  { %v518_v17 = vpop.f32.mrb[7].mxu0  ;;  %v530_v20 = vmax.f32 %v1157_v15, 0.0 }
 0x451   :  { %v529_v18 = vmax.f32 %v518_v17, 0.0  ;;  %1162 = vmatprep.mubr.msk.f32.mxu1 %vm136_vm1, %v527_v14 }
 0x452   :  { %1163 = vmatmul.mubr.msk.f32.vlgmr.msra.gmra.mrb[4].mxu1 %vm136_vm1, %v528_v16 }
 0x453   :  { %1165 = vmatprep.mubr.msk.f32.mxu1 %vm136_vm1, %v529_v18 }
 0x456   :  { %1166 = vmatmul.mubr.msk.f32.gmra.mrb[6].mxu1 %vm136_vm1, %v530_v20 }
 0x525   :  { %v1164_v22 = vpop.f32.mrb[4].mxu1 }
 0x526   :  { %v624_v23 = vadd.f32 %v1164_v22, %v1062_v21  ;;  %v618_v24 = vpop.f32.mrb[5].mxu1 }
 0x527   :  { %v619_v25 = vadd.f32 %v1062_v21, %v618_v24 }
 0x529   :  { %v1167_v26 = vpop.f32.mrb[6].mxu1  ;;  %1172 = vmatprep.mubr.msk.f32.mxu0 %vm136_vm1, %v619_v25  ;;  %v1262_v27 = vpack.i.bf16 %v624_v23, %v619_v25 }
 0x52a   :  { %v634_v28 = vadd.f32 %v1167_v26, %v1062_v21  ;;  %v628_v29 = vpop.f32.mrb[7].mxu1 }
 0x52b   :  { %v629_v30 = vadd.f32 %v1062_v21, %v628_v29  ;;  %1263 = vrot.lane.b32.xlu1 %v1262_v27, %s1314_s0 }
 0x52d   :  { %1179 = vmatprep.mubr.msk.f32.mxu1 %vm136_vm1, %v629_v30  ;;  %v1267_v31 = vpack.i.bf16 %v634_v28, %v629_v30 }
 0x52f   :  { %1268 = vrot.lane.b32.xlu1 %v1267_v31, %s1314_s0 }
 0x59d   :  { %v1264_v32 = vpop.permute.xlu1 %1263 }
 0x59e   :  { %v1266_v33 = vunpack.i.h.bf16 %v1264_v32  ;;  %v1265_v34 = vunpack.i.l.bf16 %v1264_v32 }
 0x5a0   :  { %v1220_v35 = vpack.c.bf16 %v1266_v33, %v1265_v34 }
 0x5a1   :  { %v1269_v36 = vpop.permute.xlu1 %1268 }
 0x5a2   :  { %v1271_v37 = vunpack.i.h.bf16 %v1269_v36  ;;  %v1270_v38 = vunpack.i.l.bf16 %v1269_v36  ;;  %1222 = vmatprep.subr.msk.bf16.mxu0 %vm1377_vm2, %v1220_v35 }
 0x5a3   :  { %1225 = vmatpush3.bf16.xpose.msk.msra.mxu0 %vm1377_vm2, %v1220_v35 }
 0x5a4   :  { %v1226_v39 = vpack.c.bf16 %v1271_v37, %v1270_v38 }
 0x5a6   :  { %1228 = vmatprep.subr.msk.bf16.mxu1 %vm1377_vm2, %v1226_v39 }
 0x5a7   :  { %1231 = vmatpush3.bf16.xpose.msk.msra.mxu1 %vm1377_vm2, %v1226_v39 }
 0x5aa   :  { %1173 = vmatmul.mubr.msk.f32.vlgmr.msra.gmra.mrb[8].mxu0 %vm136_vm1, %v624_v23 }
 0x5ae   :  { %1180 = vmatmul.mubr.msk.f32.vlgmr.msra.gmra.mrb[8].mxu1 %vm136_vm1, %v634_v28 }
 0x67d   :  { %v1174_v40 = vpop.f32.mrb[8].mxu0 }
 0x67e   :  { %v717_v41 = vpop.f32.mrb[9].mxu0  ;;  %v818_v46 = vsel %vm136_vm1, %v1174_v40, -inf }
 0x67f   :  { %v815_v42 = vsel %vm136_vm1, %v717_v41, -inf }
 0x680   :  { %816 = vmax.xlane.f32.xlu1 %v815_v42 }
 0x681   :  { %v1181_v43 = vpop.f32.mrb[8].mxu1 }
 0x682   :  { %v806_v44 = vpop.f32.mrb[9].mxu1  ;;  %v824_v19 = vsel %vm136_vm1, %v1181_v43, -inf }
 0x683   :  { %v821_v45 = vsel %vm136_vm1, %v806_v44, -inf }
 0x684   :  { %822 = vmax.xlane.f32.xlu0 %v821_v45  ;;  %819 = vmax.xlane.f32.xlu1 %v818_v46 }
 0x688   :  { %825 = vmax.xlane.f32.xlu0 %v824_v19 }
 0x70d   :  { %v817_v47 = vpop.xlane.xlu1 %816 }
 0x70e   :  { %v827_v48 = vsub.f32 %v717_v41, %v817_v47 }
 0x710   :  { %v831_v54 = vmul.f32 1.442695, %v827_v48 }
 0x711   :  { %v823_v49 = vpop.xlane.xlu0 %822  ;;  %v820_v50 = vpop.xlane.xlu1 %819 }
 0x712   :  { %v828_v51 = vsub.f32 %v1174_v40, %v820_v50  ;;  %v829_v52 = vsub.f32 %v806_v44, %v823_v49 }
 0x714   :  { %v833_v53 = vmul.f32 1.442695, %v828_v51  ;;  %v835_v57 = vmul.f32 1.442695, %v829_v52 }
 0x715   :  { %v826_v55 = vpop.xlane.xlu0 %825 }
 0x716   :  { %v830_v56 = vsub.f32 %v1181_v43, %v826_v55  ;;  %1298 = vpow2.f32 %v833_v53 }
 0x717   :  { %1300 = vpow2.f32 %v831_v54 }
 0x718   :  { %v837_v58 = vmul.f32 1.442695, %v830_v56 }
 0x71a   :  { %1302 = vpow2.f32 %v837_v58 }
 0x71b   :  { %1304 = vpow2.f32 %v835_v57 }
 0x720   :  { %v1299_v59 = vpop.eup %1298 }
 0x721   :  { %v842_v60 = vsel %vm136_vm1, %v1299_v59, 0.0  ;;  %v1301_v61 = vpop.eup %1300 }
 0x722   :  { %843 = vadd.xlane.f32.xlu1 %v842_v60  ;;  %v839_v1 = vsel %vm136_vm1, %v1301_v61, 0.0 }
 0x724   :  { %v1303_v62 = vpop.eup %1302 }
 0x725   :  { %v848_v63 = vsel %vm136_vm1, %v1303_v62, 0.0  ;;  %v1305_v0 = vpop.eup %1304 }
 0x726   :  { %849 = vadd.xlane.f32.xlu0 %v848_v63  ;;  %840 = vadd.xlane.f32.xlu1 %v839_v1  ;;  %v845_v2 = vsel %vm136_vm1, %v1305_v0, 0.0 }
 0x72a   :  { %846 = vadd.xlane.f32.xlu0 %v845_v2 }
 0x737   :  { %1273 = vrot.lane.b32.xlu1 %v1262_v27, %s1315_s2 }
 0x740   :  { %1278 = vrot.lane.b32.xlu0 %v1267_v31, %s1315_s2 }
 0x7af   :  { %v844_v3 = vpop.xlane.xlu1 %843 }
 0x7b0   :  { %1306 = vrcp.f32 %v844_v3 }
 0x7b3   :  { %v850_v4 = vpop.xlane.xlu0 %849  ;;  %v841_v5 = vpop.xlane.xlu1 %840 }
 0x7b4   :  { %1308 = vrcp.f32 %v841_v5 }
 0x7b5   :  { %1310 = vrcp.f32 %v850_v4 }
 0x7b7   :  { %v847_v6 = vpop.xlane.xlu0 %846  ;;  %v1274_v7 = vpop.permute.xlu1 %1273 }
 0x7b8   :  { %1312 = vrcp.f32 %v847_v6  ;;  %v1276_v8 = vunpack.i.h.bf16 %v1274_v7  ;;  %v1275_v9 = vunpack.i.l.bf16 %v1274_v7 }
 0x7ba   :  { %v1232_v10 = vpack.c.bf16 %v1276_v8, %v1275_v9  ;;  %v1307_v14 = vpop.eup %1306 }
 0x7bb   :  { %v1279_v11 = vpop.permute.xlu0 %1278  ;;  %v856_v20 = vmul.f32 %v1307_v14, %v1299_v59 }
 0x7bc   :  { %v1281_v12 = vunpack.i.h.bf16 %v1279_v11  ;;  %v1280_v13 = vunpack.i.l.bf16 %v1279_v11  ;;  %1233 = vmatprep.subr.bf16.mxu0 %v1232_v10 }
 0x7bd   :  { %1235 = vmatpush3.bf16.msra.mxu0 %v1232_v10 }
 0x7be   :  { %v1236_v15 = vpack.c.bf16 %v1281_v12, %v1280_v13  ;;  %v1309_v16 = vpop.eup %1308 }
 0x7bf   :  { %v855_v17 = vmul.f32 %v1309_v16, %v1301_v61  ;;  %v1311_v18 = vpop.eup %1310 }
 0x7c0   :  { %1237 = vmatprep.subr.bf16.mxu1 %v1236_v15  ;;  %v858_v23 = vmul.f32 %v1311_v18, %v1303_v62 }
 0x7c1   :  { %1239 = vmatpush3.bf16.msra.mxu1 %v1236_v15  ;;  %1186 = vmatprep.mubr.msk.f32.mxu0 %vm136_vm1, %v855_v17 }
 0x7c2   :  { %v1313_v21 = vpop.eup %1312  ;;  %1187 = vmatmul.mubr.msk.f32.vlgmr.msra.gmra.mrb[10].mxu0 %vm136_vm1, %v856_v20 }
 0x7c3   :  { %v857_v22 = vmul.f32 %v1313_v21, %v1305_v0 }
 0x7c5   :  { %1193 = vmatprep.mubr.msk.f32.mxu1 %vm136_vm1, %v857_v22 }
 0x7c6   :  { %1194 = vmatmul.mubr.msk.f32.vlgmr.msra.gmra.mrb[10].mxu1 %vm136_vm1, %v858_v23 }
 0x895   :  { %v1188_v24 = vpop.f32.mrb[10].mxu0 }
 0x896   :  { %v1034_v25 = vmax.f32 %v1188_v24, 0.0  ;;  %v937_v26 = vpop.f32.mrb[11].mxu0 }
 0x897   :  { %v1033_v27 = vmax.f32 %v937_v26, 0.0 }
 0x898   :  { %1038 = vst.msk [vmem:[%s1468_s5 + $0x8] sm:$0xff] %vm32_vm0, %v1034_v25 }
 0x899   :  { %v1195_v28 = vpop.f32.mrb[10].mxu1  ;;  %1037 = vst.msk [vmem:[%s1468_s5] sm:$0xff] %vm32_vm0, %v1033_v27 }
 0x89a   :  { %v1036_v29 = vmax.f32 %v1195_v28, 0.0  ;;  %v1024_v30 = vpop.f32.mrb[11].mxu1 }
 0x89b   :  { %v1035_v31 = vmax.f32 %v1024_v30, 0.0 }
 0x89c   :  { %1040 = vst.msk [vmem:[%s1468_s5 + $0x18] sm:$0xff] %vm32_vm0, %v1036_v29 }
 0x89d   :  { %1039 = vst.msk [vmem:[%s1468_s5 + $0x10] sm:$0xff] %vm32_vm0, %v1035_v31 }

</bundles_post_ra>
